<compile_context>
chip_gen: v7x
topology: tpu7x:2x2x1
jax: 0.10.0
libtpu: 0.0.40
codegen_flags: <defaults>
</compile_context>

<pallas_src>
import functools

import jax
import jax.numpy as jnp
from jax.experimental import pallas as pl
from jax.experimental.pallas import tpu as pltpu


_MAX_TILE_B = 512     # multiple of 8 (f32 sublanes) and of 128 (lane-dense out)


def _round_up(x, m):
    return -(-x // m) * m


def _tile_plan(batch):
    """Return (tile_b, padded_batch)."""
    if batch <= _MAX_TILE_B:
        tile = _round_up(max(batch, 1), 8)
        return tile, tile                       # single tile (block == full dim)
    return _MAX_TILE_B, _round_up(batch, _MAX_TILE_B)


def _pad_idx(idx, total):
    idx = idx.astype(jnp.int32)
    pad = total - idx.shape[0]
    if pad:
        idx = jnp.pad(idx, (0, pad))            # pad with row 0 (valid, discarded)
    return idx


# ---------------------------------------------------------------------------
# In-kernel embedding gather: DMA rows HBM -> VMEM scratch for one batch tile.
# All row copies are issued first (so they overlap), then both sems drained.
# ---------------------------------------------------------------------------
def _gather_embeddings(uidx_ref, iidx_ref, uemb_hbm, iemb_hbm,
                       u_buf, i_buf, sem, base, tile_b):
    @pl.loop(0, tile_b)
    def _issue(r):
        u = uidx_ref[base + r]
        pltpu.make_async_copy(uemb_hbm.at[pl.ds(u, 1), :],
                              u_buf.at[pl.ds(r, 1), :], sem.at[0]).start()
        v = iidx_ref[base + r]
        pltpu.make_async_copy(iemb_hbm.at[pl.ds(v, 1), :],
                              i_buf.at[pl.ds(r, 1), :], sem.at[1]).start()

    @pl.loop(0, tile_b)
    def _drain(r):
        # Waits only need (sem, bytes); all row copies have identical size.
        pltpu.make_async_copy(uemb_hbm.at[pl.ds(0, 1), :],
                              u_buf.at[pl.ds(0, 1), :], sem.at[0]).wait()
        pltpu.make_async_copy(iemb_hbm.at[pl.ds(0, 1), :],
                              i_buf.at[pl.ds(0, 1), :], sem.at[1]).wait()


# ---------------------------------------------------------------------------
# Kernels
# ---------------------------------------------------------------------------
def _mlp_head_kernel(uidx_ref, iidx_ref,                        # scalar prefetch (SMEM)
                     uemb_hbm, iemb_hbm,                         # HBM tables (pl.ANY)
                     w1u_ref, w1i_ref, b1_ref, w2_ref, b2_ref,   # VMEM-resident params
                     o_ref,                                      # (1, tile_b) output
                     u_buf, i_buf, sem,                          # scratch
                     *, tile_b):
    base = pl.program_id(0) * tile_b
    _gather_embeddings(uidx_ref, iidx_ref, uemb_hbm, iemb_hbm,
                       u_buf, i_buf, sem, base, tile_b)

    u = u_buf[...]                                               # (tile_b, dim)
    it = i_buf[...]                                              # (tile_b, dim)
    # h = relu(cat([u, i]) @ W1 + b1), with W1 pre-split (no in-kernel concat).
    h = jnp.dot(u, w1u_ref[...], preferred_element_type=jnp.float32)
    h = h + jnp.dot(it, w1i_ref[...], preferred_element_type=jnp.float32)
    h = jnp.maximum(h + b1_ref[...], 0.0)                        # (tile_b, 64)
    # Second layer (64 -> 1): VPU multiply + lane reduction (skip the MXU).
    z = jnp.sum(h * w2_ref[...], axis=1).reshape(1, tile_b) + b2_ref[...]
    o_ref[...] = jax.nn.sigmoid(z)                               # lane-dense row


def _ctr_kernel(uidx_ref, iidx_ref, uemb_hbm, iemb_hbm, o_ref,
                u_buf, i_buf, sem, *, tile_b):
    base = pl.program_id(0) * tile_b
    _gather_embeddings(uidx_ref, iidx_ref, uemb_hbm, iemb_hbm,
                       u_buf, i_buf, sem, base, tile_b)
    s = jnp.sum(u_buf[...] * i_buf[...], axis=1).reshape(1, tile_b)
    o_ref[...] = jax.nn.sigmoid(s)


# ---------------------------------------------------------------------------
# Wrappers (pallas_call plumbing)
# ---------------------------------------------------------------------------
_ANY_SPEC = pl.BlockSpec(memory_space=pl.ANY)


def _resident(shape):
    # Constant index_map: the block index never changes, so the parameter is
    # DMA'd once and stays resident in VMEM for all batch tiles.
    return pl.BlockSpec(shape, lambda t, u_idx, i_idx: (0,) * len(shape))


def _mlp_head(userIdx, itemIdx, uEmbed, iEmbed, w1u, w1i, b1, w2row, b2):
    batch = userIdx.shape[0]
    dim = uEmbed.shape[1]
    tile_b, padded = _tile_plan(batch)
    grid = (padded // tile_b,)
    kernel = functools.partial(_mlp_head_kernel, tile_b=tile_b)
    out = pl.pallas_call(
        kernel,
        out_shape=jax.ShapeDtypeStruct((1, padded), jnp.float32),
        grid_spec=pltpu.PrefetchScalarGridSpec(
            num_scalar_prefetch=2,
            grid=grid,
            in_specs=[
                _ANY_SPEC,                      # uEmbed stays in HBM
                _ANY_SPEC,                      # iEmbed stays in HBM
                _resident(w1u.shape),
                _resident(w1i.shape),
                _resident(b1.shape),
                _resident(w2row.shape),
                _resident(b2.shape),
            ],
            out_specs=pl.BlockSpec((1, tile_b), lambda t, u_idx, i_idx: (0, t)),
            scratch_shapes=[
                pltpu.VMEM((tile_b, dim), jnp.float32),
                pltpu.VMEM((tile_b, dim), jnp.float32),
                pltpu.SemaphoreType.DMA((2,)),
            ],
        ),
        compiler_params=pltpu.CompilerParams(
            dimension_semantics=("parallel",)),
    )(_pad_idx(userIdx, padded), _pad_idx(itemIdx, padded),
      uEmbed, iEmbed, w1u, w1i, b1, w2row, b2)
    return out.reshape(-1)[:batch]


def _ctr(userIdx, itemIdx, uEmbed, iEmbed):
    batch = userIdx.shape[0]
    dim = uEmbed.shape[1]
    tile_b, padded = _tile_plan(batch)
    grid = (padded // tile_b,)
    kernel = functools.partial(_ctr_kernel, tile_b=tile_b)
    out = pl.pallas_call(
        kernel,
        out_shape=jax.ShapeDtypeStruct((1, padded), jnp.float32),
        grid_spec=pltpu.PrefetchScalarGridSpec(
            num_scalar_prefetch=2,
            grid=grid,
            in_specs=[_ANY_SPEC, _ANY_SPEC],
            out_specs=pl.BlockSpec((1, tile_b), lambda t, u_idx, i_idx: (0, t)),
            scratch_shapes=[
                pltpu.VMEM((tile_b, dim), jnp.float32),
                pltpu.VMEM((tile_b, dim), jnp.float32),
                pltpu.SemaphoreType.DMA((2,)),
            ],
        ),
        compiler_params=pltpu.CompilerParams(
            dimension_semantics=("parallel",)),
    )(_pad_idx(userIdx, padded), _pad_idx(itemIdx, padded), uEmbed, iEmbed)
    return out.reshape(-1)[:batch]


# ---------------------------------------------------------------------------
# MF_multi model (parameters + forward)
# ---------------------------------------------------------------------------
class MFMultiPallas:
    # TODO(synk): BCELoss / create_*_loss / do_recommendation* are host-side
    # training / top-k orchestration over forward(); not translated to Pallas.
    def __init__(self, userNum, itemNum, dim, loss, key):
        self.L = loss
        self.dim = dim
        k = jax.random.split(key, 10)
        # nn.Embedding weights, normal std=0.01 (matches nn.init.normal_ std=0.01)
        self.uEmbed = 0.01 * jax.random.normal(k[0], (userNum, dim), jnp.float32)
        self.iEmbed = 0.01 * jax.random.normal(k[1], (itemNum, dim), jnp.float32)

        def linear_init(kw, kb, fan_in, fan_out):
            # PyTorch nn.Linear default: U(-1/sqrt(fan_in), 1/sqrt(fan_in))
            bound = 1.0 / (fan_in ** 0.5)
            w = jax.random.uniform(kw, (fan_in, fan_out), jnp.float32,
                                   minval=-bound, maxval=bound)   # stored (in, out)
            b = jax.random.uniform(kb, (1, fan_out), jnp.float32,
                                   minval=-bound, maxval=bound)
            return w, b

        # cvr head: Linear(2*dim -> 64), Linear(64 -> 1)
        self.cvr_w, self.cvr_b = linear_init(k[2], k[3], 2 * dim, 64)
        self.cvr1_w, self.cvr1_b = linear_init(k[4], k[5], 64, 1)
        # imp head: Linear(2*dim -> 64), Linear(64 -> 1)
        self.imp_w, self.imp_b = linear_init(k[6], k[7], 2 * dim, 64)
        self.imp1_w, self.imp1_b = linear_init(k[8], k[9], 64, 1)

        # Kernel-friendly views: split W1 (removes in-kernel concat) and store
        # the (64, 1) second-layer weight as a (1, 64) row for the VPU reduce.
        self.cvr_w_u, self.cvr_w_i = self.cvr_w[:dim], self.cvr_w[dim:]
        self.imp_w_u, self.imp_w_i = self.imp_w[:dim], self.imp_w[dim:]
        self.cvr1_row = self.cvr1_w.T          # (1, 64)
        self.imp1_row = self.imp1_w.T          # (1, 64)

    def forward(self, userIdx, itemIdx, task):
        if self.L in ('multi', 'IPS+DR'):
            if task == 'cvr':
                return _mlp_head(userIdx, itemIdx, self.uEmbed, self.iEmbed,
                                 self.cvr_w_u, self.cvr_w_i, self.cvr_b,
                                 self.cvr1_row, self.cvr1_b)
            if task == 'ctr':
                return _ctr(userIdx, itemIdx, self.uEmbed, self.iEmbed)
            if task == 'imp' and self.L == 'IPS+DR':
                # abs(sigmoid(x)) == sigmoid(x); the redundant abs is dropped.
                return _mlp_head(userIdx, itemIdx, self.uEmbed, self.iEmbed,
                                 self.imp_w_u, self.imp_w_i, self.imp_b,
                                 self.imp1_row, self.imp1_b)
        raise ValueError(f"unsupported task={task!r} for loss={self.L!r}")


# ---------------------------------------------------------------------------
# Pure-JAX reference (mirrors the PyTorch forward) for correctness check
# ---------------------------------------------------------------------------
def _ref_forward(m, userIdx, itemIdx, task):
    u = jnp.take(m.uEmbed, userIdx, axis=0)
    i = jnp.take(m.iEmbed, itemIdx, axis=0)
    if task == 'ctr':
        return jax.nn.sigmoid(jnp.sum(u * i, axis=1))
    x = jnp.concatenate([u, i], axis=1)
    if task == 'cvr':
        h = jnp.maximum(x @ m.cvr_w + m.cvr_b, 0.0)
        return jax.nn.sigmoid(h @ m.cvr1_w + m.cvr1_b).reshape(-1)
    if task == 'imp':
        h = jnp.maximum(x @ m.imp_w + m.imp_b, 0.0)
        return jnp.abs(jax.nn.sigmoid(h @ m.imp1_w + m.imp1_b)).reshape(-1)
    raise ValueError(task)


if __name__ == "__main__":
    key = jax.random.PRNGKey(0)
    k_model, k_u, k_i = jax.random.split(key, 3)

    userNum, itemNum, dim, B = 100, 200, 32, 8
    model = MFMultiPallas(userNum, itemNum, dim, loss='IPS+DR', key=k_model)

    userIdx = jax.random.randint(k_u, (B,), 0, userNum, dtype=jnp.int32)
    itemIdx = jax.random.randint(k_i, (B,), 0, itemNum, dtype=jnp.int32)

    ok = True
    for task in ('cvr', 'ctr', 'imp'):
        out = jax.block_until_ready(model.forward(userIdx, itemIdx, task))
        ref = _ref_forward(model, userIdx, itemIdx, task)
        assert out.shape == (B,), (task, out.shape)
        ok &= bool(jnp.allclose(out, ref, atol=1e-5, rtol=1e-5))

    if ok:
        print("KERNEL_OK")
</pallas_src>

<mosaic_0001>
module attributes {stable_mosaic.version = 11 : i64} {
  func.func @_mlp_head_kernel(%arg0: i32, %arg1: memref<8xi32, #tpu.memory_space<smem>>, %arg2: memref<8xi32, #tpu.memory_space<smem>>, %arg3: memref<100x32xf32, #tpu.memory_space<any>>, %arg4: memref<200x32xf32, #tpu.memory_space<any>>, %arg5: memref<32x64xf32, #tpu.memory_space<vmem>>, %arg6: memref<32x64xf32, #tpu.memory_space<vmem>>, %arg7: memref<1x64xf32, #tpu.memory_space<vmem>>, %arg8: memref<1x64xf32, #tpu.memory_space<vmem>>, %arg9: memref<1x1xf32, #tpu.memory_space<vmem>>, %arg10: memref<1x8xf32, #tpu.memory_space<vmem>>, %arg11: memref<8x32xf32, #tpu.memory_space<vmem>>, %arg12: memref<8x32xf32, #tpu.memory_space<vmem>>, %arg13: memref<2x!tpu.dma_semaphore, #tpu.memory_space<semaphore_mem>>) attributes {dimension_semantics = [#tpu.dimension_semantics<parallel>], iteration_bounds = array<i64: 1>, scalar_prefetch = 2 : i64, scratch_operands = 3 : i64, tpu.core_type = #tpu.core_type<tc>, window_params = [{}, {}, {pipeline_mode = #tpu.pipeline_mode<synchronous>, transform_indices = @transform_2, window_bounds = array<i64: 32, 64>}, {pipeline_mode = #tpu.pipeline_mode<synchronous>, transform_indices = @transform_3, window_bounds = array<i64: 32, 64>}, {pipeline_mode = #tpu.pipeline_mode<synchronous>, transform_indices = @transform_4, window_bounds = array<i64: 1, 64>}, {pipeline_mode = #tpu.pipeline_mode<synchronous>, transform_indices = @transform_5, window_bounds = array<i64: 1, 64>}, {pipeline_mode = #tpu.pipeline_mode<synchronous>, transform_indices = @transform_6, window_bounds = array<i64: 1, 1>}, {transform_indices = @transform_7, window_bounds = array<i64: 1, 8>}]} {
    %c8_i32 = arith.constant 8 : i32
    %0 = arith.muli %arg0, %c8_i32 : i32
    %c0_i32 = arith.constant 0 : i32
    %c8_i32_0 = arith.constant 8 : i32
    %1 = arith.addi %c0_i32, %c8_i32_0 : i32
    %c1_i32 = arith.constant 1 : i32
    scf.for %arg14 = %c0_i32 to %1 step %c1_i32  : i32 {
      %c1_i32_24 = arith.constant 1 : i32
      %29 = arith.muli %arg14, %c1_i32_24 : i32
      %c0_i32_25 = arith.constant 0 : i32
      %30 = arith.addi %c0_i32_25, %29 : i32
      %31 = arith.addi %0, %30 : i32
      %32 = arith.index_cast %31 : i32 to index
      %33 = memref.load %arg1[%32] : memref<8xi32, #tpu.memory_space<smem>>
      %c0_i32_26 = arith.constant 0 : i32
      %c0_i32_27 = arith.constant 0 : i32
      %34 = tpu.memref_slice %arg3[%33, %c0_i32_27] : memref<100x32xf32, #tpu.memory_space<any>> -> memref<1x32xf32, #tpu.memory_space<any>>
      %c0_i32_28 = arith.constant 0 : i32
      %35 = tpu.memref_slice %arg11[%30, %c0_i32_28] : memref<8x32xf32, #tpu.memory_space<vmem>> -> memref<1x32xf32, #tpu.memory_space<vmem>>
      %36 = tpu.memref_slice %arg13[%c0_i32_26] : memref<2x!tpu.dma_semaphore, #tpu.memory_space<semaphore_mem>> -> memref<1x!tpu.dma_semaphore, #tpu.memory_space<semaphore_mem>>
      %37 = tpu.memref_squeeze %36 : memref<1x!tpu.dma_semaphore, #tpu.memory_space<semaphore_mem>> -> memref<!tpu.dma_semaphore, #tpu.memory_space<semaphore_mem>>
      tpu.enqueue_dma source(%34 : memref<1x32xf32, #tpu.memory_space<any>>) target(%35 : memref<1x32xf32, #tpu.memory_space<vmem>>) target_semaphore(%37 : memref<!tpu.dma_semaphore, #tpu.memory_space<semaphore_mem>>)
      %38 = arith.addi %0, %30 : i32
      %39 = arith.index_cast %38 : i32 to index
      %40 = memref.load %arg2[%39] : memref<8xi32, #tpu.memory_space<smem>>
      %c1_i32_29 = arith.constant 1 : i32
      %c0_i32_30 = arith.constant 0 : i32
      %41 = tpu.memref_slice %arg4[%40, %c0_i32_30] : memref<200x32xf32, #tpu.memory_space<any>> -> memref<1x32xf32, #tpu.memory_space<any>>
      %c0_i32_31 = arith.constant 0 : i32
      %42 = tpu.memref_slice %arg12[%30, %c0_i32_31] : memref<8x32xf32, #tpu.memory_space<vmem>> -> memref<1x32xf32, #tpu.memory_space<vmem>>
      %43 = tpu.memref_slice %arg13[%c1_i32_29] : memref<2x!tpu.dma_semaphore, #tpu.memory_space<semaphore_mem>> -> memref<1x!tpu.dma_semaphore, #tpu.memory_space<semaphore_mem>>
      %44 = tpu.memref_squeeze %43 : memref<1x!tpu.dma_semaphore, #tpu.memory_space<semaphore_mem>> -> memref<!tpu.dma_semaphore, #tpu.memory_space<semaphore_mem>>
      tpu.enqueue_dma source(%41 : memref<1x32xf32, #tpu.memory_space<any>>) target(%42 : memref<1x32xf32, #tpu.memory_space<vmem>>) target_semaphore(%44 : memref<!tpu.dma_semaphore, #tpu.memory_space<semaphore_mem>>)
    }
    %c8_i32_1 = arith.constant 8 : i32
    %c0_i32_2 = arith.constant 0 : i32
    %c8_i32_3 = arith.constant 8 : i32
    %2 = arith.addi %c0_i32_2, %c8_i32_3 : i32
    %c1_i32_4 = arith.constant 1 : i32
    scf.for %arg14 = %c0_i32_2 to %2 step %c1_i32_4  : i32 {
      %c0_i32_24 = arith.constant 0 : i32
      %c0_i32_25 = arith.constant 0 : i32
      %c0_i32_26 = arith.constant 0 : i32
      %29 = tpu.memref_slice %arg3[%c0_i32_25, %c0_i32_26] : memref<100x32xf32, #tpu.memory_space<any>> -> memref<1x32xf32, #tpu.memory_space<any>>
      %c0_i32_27 = arith.constant 0 : i32
      %c0_i32_28 = arith.constant 0 : i32
      %30 = tpu.memref_slice %arg11[%c0_i32_27, %c0_i32_28] : memref<8x32xf32, #tpu.memory_space<vmem>> -> memref<1x32xf32, #tpu.memory_space<vmem>>
      %31 = tpu.memref_slice %arg13[%c0_i32_24] : memref<2x!tpu.dma_semaphore, #tpu.memory_space<semaphore_mem>> -> memref<1x!tpu.dma_semaphore, #tpu.memory_space<semaphore_mem>>
      %32 = tpu.memref_squeeze %31 : memref<1x!tpu.dma_semaphore, #tpu.memory_space<semaphore_mem>> -> memref<!tpu.dma_semaphore, #tpu.memory_space<semaphore_mem>>
      tpu.wait_dma2 semaphore(%32 : memref<!tpu.dma_semaphore, #tpu.memory_space<semaphore_mem>>) src(%29 : memref<1x32xf32, #tpu.memory_space<any>>) dst(%30 : memref<1x32xf32, #tpu.memory_space<vmem>>)
      %c1_i32_29 = arith.constant 1 : i32
      %c0_i32_30 = arith.constant 0 : i32
      %c0_i32_31 = arith.constant 0 : i32
      %33 = tpu.memref_slice %arg4[%c0_i32_30, %c0_i32_31] : memref<200x32xf32, #tpu.memory_space<any>> -> memref<1x32xf32, #tpu.memory_space<any>>
      %c0_i32_32 = arith.constant 0 : i32
      %c0_i32_33 = arith.constant 0 : i32
      %34 = tpu.memref_slice %arg12[%c0_i32_32, %c0_i32_33] : memref<8x32xf32, #tpu.memory_space<vmem>> -> memref<1x32xf32, #tpu.memory_space<vmem>>
      %35 = tpu.memref_slice %arg13[%c1_i32_29] : memref<2x!tpu.dma_semaphore, #tpu.memory_space<semaphore_mem>> -> memref<1x!tpu.dma_semaphore, #tpu.memory_space<semaphore_mem>>
      %36 = tpu.memref_squeeze %35 : memref<1x!tpu.dma_semaphore, #tpu.memory_space<semaphore_mem>> -> memref<!tpu.dma_semaphore, #tpu.memory_space<semaphore_mem>>
      tpu.wait_dma2 semaphore(%36 : memref<!tpu.dma_semaphore, #tpu.memory_space<semaphore_mem>>) src(%33 : memref<1x32xf32, #tpu.memory_space<any>>) dst(%34 : memref<1x32xf32, #tpu.memory_space<vmem>>)
    }
    %c0 = arith.constant 0 : index
    %c0_5 = arith.constant 0 : index
    %3 = vector.load %arg11[%c0, %c0_5] : memref<8x32xf32, #tpu.memory_space<vmem>>, vector<8x32xf32>
    %c0_6 = arith.constant 0 : index
    %c0_7 = arith.constant 0 : index
    %4 = vector.load %arg12[%c0_6, %c0_7] : memref<8x32xf32, #tpu.memory_space<vmem>>, vector<8x32xf32>
    %c0_8 = arith.constant 0 : index
    %c0_9 = arith.constant 0 : index
    %5 = vector.load %arg5[%c0_8, %c0_9] : memref<32x64xf32, #tpu.memory_space<vmem>>, vector<32x64xf32>
    %cst = arith.constant dense<0.000000e+00> : vector<8x64xf32>
    %6 = tpu.matmul %3, %5, %cst {dimension_numbers = #tpu.dot_dimension_numbers<[1], [0], [0], [1], [0, 0, 1, 1], [], []>} : vector<8x32xf32>, vector<32x64xf32>, vector<8x64xf32> -> vector<8x64xf32>
    %c0_10 = arith.constant 0 : index
    %c0_11 = arith.constant 0 : index
    %7 = vector.load %arg6[%c0_10, %c0_11] : memref<32x64xf32, #tpu.memory_space<vmem>>, vector<32x64xf32>
    %cst_12 = arith.constant dense<0.000000e+00> : vector<8x64xf32>
    %8 = tpu.matmul %4, %7, %cst_12 {dimension_numbers = #tpu.dot_dimension_numbers<[1], [0], [0], [1], [0, 0, 1, 1], [], []>} : vector<8x32xf32>, vector<32x64xf32>, vector<8x64xf32> -> vector<8x64xf32>
    %9 = arith.addf %6, %8 : vector<8x64xf32>
    %c0_13 = arith.constant 0 : index
    %c0_14 = arith.constant 0 : index
    %10 = vector.load %arg7[%c0_13, %c0_14] : memref<1x64xf32, #tpu.memory_space<vmem>>, vector<1x64xf32>
    %11 = vector.broadcast %10 : vector<1x64xf32> to vector<8x64xf32>
    %12 = arith.addf %9, %11 : vector<8x64xf32>
    %cst_15 = arith.constant 0.000000e+00 : f32
    %13 = vector.broadcast %cst_15 : f32 to vector<8x64xf32>
    %14 = arith.maximumf %12, %13 : vector<8x64xf32>
    %c0_16 = arith.constant 0 : index
    %c0_17 = arith.constant 0 : index
    %15 = vector.load %arg8[%c0_16, %c0_17] : memref<1x64xf32, #tpu.memory_space<vmem>>, vector<1x64xf32>
    %16 = vector.broadcast %15 : vector<1x64xf32> to vector<8x64xf32>
    %17 = arith.mulf %14, %16 : vector<8x64xf32>
    %cst_18 = arith.constant dense<0.000000e+00> : vector<8xf32>
    %18 = vector.multi_reduction <add>, %17, %cst_18 [1] : vector<8x64xf32> to vector<8xf32>
    %19 = vector.shape_cast %18 : vector<8xf32> to vector<1x8xf32>
    %c0_19 = arith.constant 0 : index
    %c0_20 = arith.constant 0 : index
    %20 = vector.load %arg9[%c0_19, %c0_20] : memref<1x1xf32, #tpu.memory_space<vmem>>, vector<1x1xf32>
    %21 = vector.broadcast %20 : vector<1x1xf32> to vector<1x8xf32>
    %22 = arith.addf %19, %21 : vector<1x8xf32>
    %23 = arith.negf %22 : vector<1x8xf32>
    %24 = math.exp %23 : vector<1x8xf32>
    %cst_21 = arith.constant 1.000000e+00 : f32
    %25 = vector.broadcast %cst_21 : f32 to vector<1x8xf32>
    %26 = arith.addf %25, %24 : vector<1x8xf32>
    %27 = arith.divf %25, %26 : vector<1x8xf32>
    %c0_22 = arith.constant 0 : index
    %c0_23 = arith.constant 0 : index
    %28 = vector.load %arg10[%c0_22, %c0_23] : memref<1x8xf32, #tpu.memory_space<vmem>>, vector<1x8xf32>
    tpu.vector_store %arg10[%c0_22, %c0_23], %27 {strides = array<i32>} : memref<1x8xf32, #tpu.memory_space<vmem>>, vector<1x8xf32>,
    return
  }
  func.func @transform_2(%arg0: i32, %arg1: memref<8xi32, #tpu.memory_space<smem>>, %arg2: memref<8xi32, #tpu.memory_space<smem>>) -> (i32, i32) {
    %c0_i32 = arith.constant 0 : i32
    %c0_i32_0 = arith.constant 0 : i32
    %c0_i32_1 = arith.constant 0 : i32
    return %c0_i32, %c0_i32_0 : i32, i32
  }
  func.func @transform_3(%arg0: i32, %arg1: memref<8xi32, #tpu.memory_space<smem>>, %arg2: memref<8xi32, #tpu.memory_space<smem>>) -> (i32, i32) {
    %c0_i32 = arith.constant 0 : i32
    %c0_i32_0 = arith.constant 0 : i32
    %c0_i32_1 = arith.constant 0 : i32
    return %c0_i32, %c0_i32_0 : i32, i32
  }
  func.func @transform_4(%arg0: i32, %arg1: memref<8xi32, #tpu.memory_space<smem>>, %arg2: memref<8xi32, #tpu.memory_space<smem>>) -> (i32, i32) {
    %c0_i32 = arith.constant 0 : i32
    %c0_i32_0 = arith.constant 0 : i32
    %c0_i32_1 = arith.constant 0 : i32
    return %c0_i32, %c0_i32_0 : i32, i32
  }
  func.func @transform_5(%arg0: i32, %arg1: memref<8xi32, #tpu.memory_space<smem>>, %arg2: memref<8xi32, #tpu.memory_space<smem>>) -> (i32, i32) {
    %c0_i32 = arith.constant 0 : i32
    %c0_i32_0 = arith.constant 0 : i32
    %c0_i32_1 = arith.constant 0 : i32
    return %c0_i32, %c0_i32_0 : i32, i32
  }
  func.func @transform_6(%arg0: i32, %arg1: memref<8xi32, #tpu.memory_space<smem>>, %arg2: memref<8xi32, #tpu.memory_space<smem>>) -> (i32, i32) {
    %c0_i32 = arith.constant 0 : i32
    %c0_i32_0 = arith.constant 0 : i32
    %c0_i32_1 = arith.constant 0 : i32
    return %c0_i32, %c0_i32_0 : i32, i32
  }
  func.func @transform_7(%arg0: i32, %arg1: memref<8xi32, #tpu.memory_space<smem>>, %arg2: memref<8xi32, #tpu.memory_space<smem>>) -> (i32, i32) {
    %c0_i32 = arith.constant 0 : i32
    %c0_i32_0 = arith.constant 0 : i32
    return %c0_i32, %arg0 : i32, i32
  }
}

</mosaic_0001>

<bundles_post_ra>
// kernel: tpu_custom_call.1
= control target key start
LH: loop header
LB: loop body
LE: loop exit
PB: predicated region body
PF: predicated region fallthrough
CT: control target
= control target key end

     0   :  { %s681_s0 = inlined_call_operand.vmem [shape: s32[8], index: 0, kind: input, shape index: {}]   ;;  %s682_s2 = inlined_call_operand.vmem [shape: f32[100,32], index: 2, kind: input, shape index: {}]   ;;  %s683_s3 = inlined_call_operand.vmem [shape: f32[200,32], index: 3, kind: input, shape index: {}]   ;;  %s684_s4 = inlined_call_operand.vmem [shape: f32[32,64], index: 4, kind: input, shape index: {}]   ;;  %s685_s5 = inlined_call_operand.vmem [shape: f32[32,64], index: 5, kind: input, shape index: {}]   ;;  %s686_s6 = inlined_call_operand.vmem [shape: f32[1,64], index: 6, kind: input, shape index: {}]   ;;  %s687_s7 = inlined_call_operand.vmem [shape: f32[1,64], index: 7, kind: input, shape index: {}]   ;;  %s688_s9 = inlined_call_operand.hbm [shape: f32[1,8], index: 9, kind: output, shape index: {}]   ;;  %s689_s1 = inlined_call_operand.vmem [shape: s32[8], index: 1, kind: input, shape index: {}]   ;;  %s690_s8 = inlined_call_operand.<no memory space> [shape: f32[1,1], index: 8, kind: input, shape index: {}]  }
   0x1   :  { %s14_s11 = sshll.u32 %s681_s0, 4  ;;  %s18_s14 = sshll.u32 %s689_s1, 4  ;;  %v22_v0 = vstv %s690_s8  ;;  %s15_s11 = int_to_ptr.vmem [resolvable:$true] %s14_s11  ;;  %s19_s14 = int_to_ptr.vmem [resolvable:$true] %s18_s14 }
   0x2   :  { %23 = vst [vmem:[#allocation8] sm:$0x1] %v22_v0  ;;  %s497_s17 = scalar_lea.vmem %s15_s11, 16  ;;  %p502_p1 = scmp.lt.s32.totalorder %s15_s11, %s15_s11 }
   0x3   :  { %p498_p0 = scmp.ne.s32.totalorder %s15_s11, %s497_s17  ;;  %p503_p2 = scmp.lt.s32.totalorder %s497_s17, %s497_s17 }
   0x5   :  { %p504_p3 = por %p503_p2, %p502_p1 }
   0x7   :  { %p505_p4 = pnand %p504_p3, %p498_p0 }
   0x9   :  { %508 = shalt.err (!%p505_p4)  }
   0xa   :  { %s567_s18 = smov [#allocation6]   ;;  %s509_s0 = scalar_lea.vmem %s19_s14, 16 }
   0xb   :  { %17 = dma.vmem_to_smem %s15_s11, 16, %s567_s18, [#allocation5] }
   0xc   :  { %p510_p5 = scmp.ne.s32.totalorder %s19_s14, %s509_s0  ;;  %p514_p6 = scmp.lt.s32.totalorder %s19_s14, %s19_s14 }
   0xd   :  { %p515_p7 = scmp.lt.s32.totalorder %s509_s0, %s509_s0 }
   0xf   :  { %p516_p8 = por %p515_p7, %p514_p6 }
  0x11   :  { %p517_p9 = pnand %p516_p8, %p510_p5 }
  0x13   :  { %520 = shalt.err (!%p517_p9)  }
  0x14   :  { %s568_s1 = smov [#allocation7]  }
  0x15   :  { %21 = dma.vmem_to_smem %s19_s14, 16, %s568_s1, [#allocation5] }
  0x16   :  { %551 = dma.done.wait [#allocation5], 32 }
  0x17   :  { %552 = vsyncadd [#allocation5], 4294967264 }
  0x18   :  { %25 = sfence }
  0x19   :  { %26 = vsyncpa [#allocation10], 0  ;;  %s559_s8 = smov 0  }
  0x1a LB: > { %s45_s19 = sld [smem:[#allocation6 + %s561_s8]]  ;;  %s47_s23 = scalar_lea.vmem [#allocation2], %s561_s8  ;;  %s561_s8 = sphi %s559_s8, %s43_s8  }
  0x20   : > { %s46_s22 = scalar_lea.vmem %s682_s2, %s45_s19 }
  0x21   : > { %v65_v1 = vld [vmem:[%s46_s22] sm:$0x1] }
  0x22   : > { %66 = vst [vmem:[%s47_s23] sm:$0x1] %v65_v1 }
  0x23   : > { %91 = vsyncadd [#allocation4], 16  ;;  %s92_s24 = sld [smem:[#allocation7 + %s561_s8]]  ;;  %s94_s28 = scalar_lea.vmem [#allocation3], %s561_s8 }
  0x29   : > { %s93_s27 = scalar_lea.vmem %s683_s3, %s92_s24 }
  0x2a   : > { %v113_v2 = vld [vmem:[%s93_s27] sm:$0x1] }
  0x2b   : > { %114 = vst [vmem:[%s94_s28] sm:$0x1] %v113_v2 }
  0x2c   : > { %139 = vsyncadd [#allocation4 + $0x1], 16  ;;  %s43_s8 = sadd.s32 1, %s561_s8  }
  0x2d   : > { %p40_p10 = scmp.ge.s32.totalorder %s43_s8, 8  }
  0x2e   :  { %s563_s29 = smov (%p40_p10), 0  }
  0x2f   :  { %42 = sbr.rel (!%p40_p10) target bundleno = 26 (0x1a), region = 141 }
  0x36 LB: > { %553 = dma.done.wait [#allocation4], 16  ;;  %s565_s29 = sphi %s563_s29, %s145_s29  }
  0x37   : > { %554 = vsyncadd [#allocation4], 4294967280 }
  0x38   : > { %555 = dma.done.wait [#allocation4 + $0x1], 16 }
  0x39   : > { %556 = vsyncadd [#allocation4 + $0x1], 4294967280  ;;  %s145_s29 = sadd.s32 1, %s565_s29  }
  0x3a   : > { %p142_p11 = scmp.ge.s32.totalorder %s145_s29, 8  }
  0x3b   :  { %v158_v3 = vld [vmem:[%s685_s5] sm:$0xff] (%p142_p11)  ;;  %v159_v4 = vld [vmem:[%s685_s5 + $0x8] sm:$0xff] (%p142_p11)  ;;  %v569_v6 = vmov (%p142_p11), 0.0|0.0   ;;  %v160_v9 = vld [vmem:[%s685_s5 + $0x10] sm:$0xff] (%p142_p11)  ;;  %vm570_vm0 = vmmov (%p142_p11), 0   ;;  %v571_v14 = vmov (%p142_p11), 0.0   ;;  %v336_v32 = vlaneseq (%p142_p11) }
  0x3c   :  { %144 = sbr.rel (!%p142_p11) target bundleno = 54 (0x36), region = 152  ;;  %v154_v5 = vld [vmem:[%s684_s4] sm:$0xff] (%p142_p11)  ;;  %457 = vmatprep.subr.bf16.mxu0 (%p142_p11), %v569_v6  ;;  %463 = vmatprep.subr.bf16.mxu1 (%p142_p11), %v569_v6  ;;  %v458_v7 = vpack.c.bf16 (%p142_p11), %v159_v4, %v158_v3  ;;  %v155_v8 = vld [vmem:[%s684_s4 + $0x8] sm:$0xff] (%p142_p11)  ;;  %v161_v10 = vld [vmem:[%s685_s5 + $0x18] sm:$0xff] (%p142_p11)  ;;  %vm162_vm1 = vcmask (%p142_p11), 261120   ;;  %v572_v19 = vmov (%p142_p11), 0  }
  0x3d   :  { %v464_v11 = vpack.c.bf16 (%p142_p11), %v155_v8, %v154_v5  ;;  %v156_v12 = vld [vmem:[%s684_s4 + $0x10] sm:$0xff] (%p142_p11)  ;;  %v157_v13 = vld [vmem:[%s684_s4 + $0x18] sm:$0xff] (%p142_p11)  ;;  %443 = vmatprep.mubr.msk.f32.mxu0 (%p142_p11), %vm570_vm0, %v571_v14  ;;  %454 = vmatprep.mubr.msk.f32.mxu1 (%p142_p11), %vm570_vm0, %v571_v14  ;;  %v461_v15 = vpack.c.bf16 (%p142_p11), %v161_v10, %v160_v9  ;;  %v153_v17 = vld [vmem:[#allocation3] sm:$0xff] (%p142_p11)  ;;  %vm326_vm2 = vcmask (%p142_p11), 523264   ;;  %v337_v33 = vshrl.u32 (%p142_p11), %v336_v32, 7 }
  0x3e   :  { %459 = vmatpush3.bf16.msra.mxu0 (%p142_p11), %v458_v7  ;;  %v467_v16 = vpack.c.bf16 (%p142_p11), %v157_v13, %v156_v12  ;;  %v152_v18 = vld [vmem:[#allocation2] sm:$0xff] (%p142_p11)  ;;  %492 = vset.pattern.permute.xlu0 (%p142_p11), %v572_v19  ;;  %v330_v31 = vld [vmem:[#allocation8] sm:$0x1] (%p142_p11)  ;;  %v349_v42 = vand.u32 (%p142_p11), 127, %v336_v32  ;;  %vm355_vm3 = vcmask (%p142_p11), 57344  }
  0x3f   :  { %465 = vmatpush3.bf16.msra.mxu1 (%p142_p11), %v464_v11  ;;  %460 = vmatprep.subr.bf16.mxu0 (%p142_p11), %v569_v6  ;;  %v420_v22 = vld [vmem:[%s686_s6] ss:$0 sm:$0xff] (%p142_p11)  ;;  %v338_v35 = vsub.s32 (%p142_p11), 0, %v337_v33  ;;  %s573_s6 = smov (%p142_p11), [#allocation9]  }
  0x40   :  { %466 = vmatprep.subr.bf16.mxu1 (%p142_p11), %v569_v6  ;;  %v421_v27 = vld [vmem:[%s687_s7] ss:$0 sm:$0xff] (%p142_p11)  ;;  %v352_v43 = vsub.s32 (%p142_p11), %v349_v42, %v337_v33  ;;  %s363_s7 = sshll.u32 (%p142_p11), %s573_s6, 4  ;;  %s364_s7 = int_to_ptr.vmem [resolvable:$true] %s363_s7 }
  0x41   :  { %s521_s22 = scalar_lea.vmem (%p142_p11), %s364_s7, 16  ;;  %s525_s23 = scalar_lea.vmem (%p142_p11), %s364_s7, 32 }
  0x42   :  { %462 = vmatpush3.bf16.msra.mxu0 (%p142_p11), %v461_v15  ;;  %p522_p12 = scmp.ne.s32.totalorder (%p142_p11), %s364_s7, %s521_s22  ;;  %p526_p13 = scmp.lt.s32.totalorder (%p142_p11), %s364_s7, %s364_s7 }
  0x43   :  { %468 = vmatpush3.bf16.msra.mxu1 %v467_v16  ;;  %p527_p0 = scmp.lt.s32.totalorder %s525_s23, %s521_s22 }
  0x45   :  { %444 = vmatmul.mubr.msk.f32.vlgmr.msra.gmra.mrb[0].mxu0 %vm162_vm1, %v153_v17  ;;  %p528_p1 = por %p527_p0, %p526_p13 }
  0x46   :  { %455 = vmatmul.mubr.msk.f32.vlgmr.msra.gmra.mrb[0].mxu1 %vm162_vm1, %v152_v18 }
  0x47   :  { %p529_p2 = pnand %p528_p1, %p522_p12 }
 0x118   :  { %v232_v20 = vpop.f32.mrb[0].mxu0 }
 0x119   :  { %v305_v21 = vpop.f32.mrb[0].mxu1  ;;  %v445_v23 = vpop.f32.mrb[1].mxu0 }
 0x11a   :  { %v306_v24 = vadd.f32 %v305_v21, %v232_v20  ;;  %v456_v25 = vpop.f32.mrb[1].mxu1 }
 0x11c   :  { %v316_v26 = vadd.f32 %v420_v22, %v306_v24 }
 0x11e   :  { %v317_v28 = vmax.f32 %v316_v26, 0.0 }
 0x120   :  { %v325_v29 = vmul.f32 %v421_v27, %v317_v28 }
 0x122   :  { %v327_v30 = vsel %vm326_vm2, %v325_v29, 0.0 }
 0x123   :  { %328 = vadd.xlane.f32.xlu0 %v327_v30 }
 0x139   :  { %333 = vperm.xlu0 %492, %v330_v31  }
 0x1b0   :  { %v329_v34 = vpop.xlane.xlu0 %328 }
 0x1b8   :  { %v334_v36 = vpop.permute.xlu0 %333 }
 0x1b9   :  { %v339_v37 = vrot.slane %v334_v36, %v338_v35 }
 0x1bb   :  { %v340_v38 = vadd.f32 %v339_v37, %v329_v34 }
 0x1bd   :  { %v422_v39 = vmul.f32 -1.442695, %v340_v38 }
 0x1bf   :  { %493 = vpow2.f32 %v422_v39 }
 0x1c9   :  { %v494_v40 = vpop.eup %493 }
 0x1ca   :  { %v344_v41 = vadd.f32 1.0, %v494_v40 }
 0x1cc   :  { %495 = vrcp.f32 %v344_v41 }
 0x1d6   :  { %v496_v44 = vpop.eup %495 }
 0x1d7   :  { %v353_v45 = vrot.slane %v496_v44, %v352_v43 }
 0x1d9   :  { %356 = vst.msk [vmem:[#allocation9] sm:$0x1] %vm355_vm3, %v353_v45 }
 0x1da   :  { %532 = shalt.err (!%p529_p2)
}
 0x1db   :  { %s533_s26 = scalar_lea.hbm %s688_s9, 16 }
 0x1dc   :  { %p534_p3 = scmp.ne.s32.totalorder %s688_s9, %s533_s26  ;;  %p537_p4 = scmp.lt.u32.totalorder %s533_s26, %s688_s9 }
 0x1de   :  { %p539_p5 = pnand %p537_p4, %p534_p3 }
 0x1e0   :  { %542 = shalt.err (!%p539_p5)
}
 0x1e1   :  { %366 = dma.vmem_to_hbm [thread:$0]  %s364_s7, 16, %s688_s9, [#allocation10]  }
 0x1e2   :  { %557 = dma.done.wait [#allocation10], 16  }
 0x1e3   :  { %558 = vsyncadd [#allocation10], 4294967280 }
 0x1e4   :  { %370 = vsyncpa [#allocation10], 1 }
 0x1e5   :  { %371 = vsyncmov [#allocation4] }
 0x1e8   :  { %s372_s12 = vpop.sfrf %371 }
 0x1e9   :  { %p423_p6 = scmp.ne.s32.totalorder %s372_s12, 0 }
 0x1eb   :  { %376 = shalt.err (%p423_p6)  }
 0x1ec   :  { %378 = vsyncmov [#allocation4 + $0x1] }
 0x1ef   :  { %s379_s2 = vpop.sfrf %378 }
 0x1f0   :  { %p424_p7 = scmp.ne.s32.totalorder %s379_s2, 0 }
 0x1f2   :  { %383 = shalt.err (%p424_p7)  }

</bundles_post_ra>
